<compile_context>
chip_gen: v7x
topology: tpu7x:2x2x1
jax: 0.10.0
libtpu: 0.0.40
codegen_flags: <defaults>
</compile_context>

<pallas_src>
import jax
import jax.numpy as jnp
from jax import lax
from jax.experimental import pallas as pl
from jax.experimental.pallas import tpu as pltpu


def _round_up(x, m):
    return (x + m - 1) // m * m


# --------------------------------------------------------------------------- #
# Kernels: (grouped-)im2col matmul + folded-BN affine + LeakyReLU(0.2)
# --------------------------------------------------------------------------- #
def _matmul_bn_lrelu_kernel(zs_ref, w_ref, scale_ref, shift_ref, o_ref):
    # Single dot (K = 16*Cin), weights resident in VMEM across the whole grid.
    y = jnp.dot(zs_ref[0], w_ref[0], preferred_element_type=jnp.float32)
    y = y * scale_ref[...] + shift_ref[...]
    o_ref[...] = jnp.where(y >= 0.0, y, 0.2 * y).astype(o_ref.dtype)


def _grouped_matmul_bn_lrelu_kernel(zs_ref, w_ref, scale_ref, shift_ref,
                                    o_ref, acc_ref):
    # Streamed weights: reduction over the trailing "group" grid axis.
    g = pl.program_id(1)

    @pl.when(g == 0)
    def _():
        acc_ref[...] = jnp.zeros_like(acc_ref)

    acc_ref[...] += jnp.dot(zs_ref[0], w_ref[0],
                            preferred_element_type=jnp.float32)

    @pl.when(g == pl.num_programs(1) - 1)
    def _():
        y = acc_ref[...] * scale_ref[...] + shift_ref[...]
        o_ref[...] = jnp.where(y >= 0.0, y, 0.2 * y).astype(o_ref.dtype)


# --------------------------------------------------------------------------- #
# Host-side packing (one fused XLA op per layer) + layer wrapper
# --------------------------------------------------------------------------- #
def _im2col_grouped(x, group):
    """x: (N, H, W, C) NHWC. Returns ZS (group, N*Ho*Wo, (16//group)*C) bf16."""
    N, H, W, C = x.shape
    Ho, Wo = H // 2, W // 2
    xb = x.astype(jnp.bfloat16)
    xp = jnp.pad(xb, ((0, 0), (1, 1), (1, 1), (0, 0)))
    cols = [xp[:, ki:ki + 2 * (Ho - 1) + 1:2, kj:kj + 2 * (Wo - 1) + 1:2, :]
            for ki in range(4) for kj in range(4)]
    p = jnp.stack(cols, axis=3)                       # (N, Ho, Wo, 16, C)
    p = p.reshape(N * Ho * Wo, 16 * C)                # rows x (q, c)
    s = 16 // group
    zs = p.reshape(N * Ho * Wo, group, s * C)
    zs = jnp.transpose(zs, (1, 0, 2))                 # (group, Mtot, s*C)
    return zs, Ho, Wo


def _pack_weight(w, group):
    """w: torch layout (Cout, Cin, 4, 4) -> (group, (16//group)*Cin, Cout) bf16."""
    cout, cin = w.shape[0], w.shape[1]
    wq = jnp.transpose(w, (2, 3, 1, 0)).reshape(16 * cin, cout)  # rows = (q, c)
    s = 16 // group
    return wq.reshape(group, s * cin, cout).astype(jnp.bfloat16)


def _pick_group(cin, cout):
    """Weight-streaming policy: keep resident when small, stream when big."""
    full_bytes = 16 * cin * cout * 2          # full bf16 weight
    if full_bytes <= 4 * 2**20:
        return 1                              # whole weight resident in VMEM
    if full_bytes <= 16 * 2**20:
        return 4                              # 4 blocks of (4*Cin, Cout)
    return 16                                 # per-position blocks (Cin, Cout)


def conv4x4_s2_bn_lrelu(x, w_packed, scale, shift, *, tm_cap=2048):
    """Fused conv4x4/s2/p1 + folded eval-BN affine + LeakyReLU(0.2).

    x: (N, H, W, Cin) activation (f32 or bf16).
    w_packed: (group, Kg, Cout) bf16 from _pack_weight.
    scale/shift: (1, Cout) f32 folded BN affine (ones/zeros for no BN).
    Returns (N, H/2, W/2, Cout) bf16."""
    N = x.shape[0]
    group, kg, cout = w_packed.shape
    zs, ho, wo = _im2col_grouped(x, group)
    mtot = zs.shape[1]
    tm = min(tm_cap, _round_up(mtot, 8))
    mp = _round_up(mtot, tm)
    if mp != mtot:
        zs = jnp.pad(zs, ((0, 0), (0, mp - mtot), (0, 0)))
    grid_m = mp // tm

    # Explicit VMEM budget: double-buffered blocks + f32 accumulator.
    block_bytes = 2 * (tm * kg * 2 + kg * cout * 2 + tm * cout * 2) + tm * cout * 4
    vmem_limit = int(min(48 * 2**20, max(32 * 2**20, 2 * block_bytes)))

    if group == 1:
        out = pl.pallas_call(
            _matmul_bn_lrelu_kernel,
            out_shape=jax.ShapeDtypeStruct((mp, cout), jnp.bfloat16),
            grid_spec=pltpu.PrefetchScalarGridSpec(
                num_scalar_prefetch=0,
                grid=(grid_m,),
                in_specs=[
                    pl.BlockSpec((1, tm, kg), lambda i: (0, i, 0)),
                    pl.BlockSpec((1, kg, cout), lambda i: (0, 0, 0)),
                    pl.BlockSpec((1, cout), lambda i: (0, 0)),
                    pl.BlockSpec((1, cout), lambda i: (0, 0)),
                ],
                out_specs=pl.BlockSpec((tm, cout), lambda i: (i, 0))),
            compiler_params=pltpu.CompilerParams(
                dimension_semantics=("parallel",),
                vmem_limit_bytes=vmem_limit),
        )(zs, w_packed, scale, shift)
    else:
        out = pl.pallas_call(
            _grouped_matmul_bn_lrelu_kernel,
            out_shape=jax.ShapeDtypeStruct((mp, cout), jnp.bfloat16),
            grid_spec=pltpu.PrefetchScalarGridSpec(
                num_scalar_prefetch=0,
                grid=(grid_m, group),
                in_specs=[
                    pl.BlockSpec((1, tm, kg), lambda i, g: (g, i, 0)),
                    pl.BlockSpec((1, kg, cout), lambda i, g: (g, 0, 0)),
                    pl.BlockSpec((1, cout), lambda i, g: (0, 0)),
                    pl.BlockSpec((1, cout), lambda i, g: (0, 0)),
                ],
                out_specs=pl.BlockSpec((tm, cout), lambda i, g: (i, 0)),
                scratch_shapes=[pltpu.VMEM((tm, cout), jnp.float32)]),
            compiler_params=pltpu.CompilerParams(
                dimension_semantics=("parallel", "arbitrary"),
                vmem_limit_bytes=vmem_limit),
        )(zs, w_packed, scale, shift)

    return out[:mtot].reshape(N, ho, wo, cout)


# --------------------------------------------------------------------------- #
# class_conv head (M=batch, K=4*4*ndf*32, N=1): plain f32 einsum, no Pallas.
# --------------------------------------------------------------------------- #
def class_head(act_nhwc, wk_hwc):
    return jnp.einsum('nhwc,hwc->n', act_nhwc.astype(jnp.float32), wk_hwc)[:, None]


# ------------------------------ parameters --------------------------------- #
def init_params(key, input_nc, ndf):
    ks = iter(jax.random.split(key, 32))

    def conv_w(cout, cin):
        return (0.02 * jax.random.normal(next(ks), (cout, cin, 4, 4))
                ).astype(jnp.float32)

    chans = [input_nc, ndf, ndf * 2, ndf * 4, ndf * 8, ndf * 16, ndf * 32]
    p = {}
    for l in range(1, 7):
        p[f"conv{l}_w"] = conv_w(chans[l], chans[l - 1])
    p["class_w"] = conv_w(1, ndf * 32)
    # Eval-mode BatchNorm parameters for bn2..bn6 ("trained" random values so
    # the folded affine is non-trivial).
    for l in range(2, 7):
        c = chans[l]
        p[f"bn{l}_gamma"] = 1.0 + 0.2 * jax.random.normal(next(ks), (c,))
        p[f"bn{l}_beta"] = 0.1 * jax.random.normal(next(ks), (c,))
        p[f"bn{l}_mean"] = 0.1 * jax.random.normal(next(ks), (c,))
        p[f"bn{l}_var"] = jax.nn.softplus(jax.random.normal(next(ks), (c,))) + 0.5
    return p


def _bn_fold(params, l, eps=1e-5):
    scale = params[f"bn{l}_gamma"] * lax.rsqrt(params[f"bn{l}_var"] + eps)
    shift = params[f"bn{l}_beta"] - params[f"bn{l}_mean"] * scale
    return scale, shift


def prepare_params(params):
    """Hoisted (one-time) weight packing / BN folding for inference."""
    prepared = {}
    w1 = params["conv1_w"]
    cout1, cin1 = w1.shape[0], w1.shape[1]
    prepared["conv1_w"] = _pack_weight(w1, _pick_group(cin1, cout1))
    prepared["conv1_scale"] = jnp.ones((1, cout1), jnp.float32)
    prepared["conv1_shift"] = jnp.zeros((1, cout1), jnp.float32)
    for l in range(2, 7):
        w = params[f"conv{l}_w"]
        cout, cin = w.shape[0], w.shape[1]
        prepared[f"conv{l}_w"] = _pack_weight(w, _pick_group(cin, cout))
        scale, shift = _bn_fold(params, l)
        prepared[f"conv{l}_scale"] = scale.reshape(1, cout).astype(jnp.float32)
        prepared[f"conv{l}_shift"] = shift.reshape(1, cout).astype(jnp.float32)
    prepared["class_w"] = jnp.transpose(params["class_w"][0], (1, 2, 0)
                                        ).astype(jnp.float32)        # (4,4,Cin)
    return prepared


# ------------------------------ forward pass ------------------------------- #
def discriminator_256_dp(prepared, x_nchw):
    act = jnp.transpose(x_nchw, (0, 2, 3, 1))            # NHWC, once
    for l in range(1, 7):
        act = conv4x4_s2_bn_lrelu(act,
                                  prepared[f"conv{l}_w"],
                                  prepared[f"conv{l}_scale"],
                                  prepared[f"conv{l}_shift"])
        # TODO(synk): nn.Dropout(0.5) after each activation is identity in
        # eval mode; training-mode dropout is not implemented.
    return class_head(act, prepared["class_w"])           # (N, 1)


# -------------------------- pure-JAX reference ----------------------------- #
def discriminator_256_dp_ref(params, x_nchw):
    x = jnp.transpose(x_nchw, (0, 2, 3, 1))

    def conv(v, w):
        return lax.conv_general_dilated(
            v.astype(jnp.bfloat16),
            jnp.transpose(w, (2, 3, 1, 0)).astype(jnp.bfloat16),
            (2, 2), ((1, 1), (1, 1)),
            dimension_numbers=("NHWC", "HWIO", "NHWC"),
            preferred_element_type=jnp.float32)

    lrelu = lambda v: jnp.where(v >= 0, v, 0.2 * v)
    act = lrelu(conv(x, params["conv1_w"])).astype(jnp.bfloat16)
    for l in range(2, 7):
        scale, shift = _bn_fold(params, l)
        y = conv(act, params[f"conv{l}_w"]) * scale + shift
        act = lrelu(y).astype(jnp.bfloat16)
    wk = jnp.transpose(params["class_w"][0], (1, 2, 0)).astype(jnp.float32)
    return jnp.einsum('nhwc,hwc->n', act.astype(jnp.float32), wk)[:, None]


# ---------------------------------- main ----------------------------------- #
if __name__ == "__main__":
    key = jax.random.PRNGKey(0)
    k_param, k_x = jax.random.split(key)

    # input_nc = 3; ndf scaled 64 -> 8 for a small demo; spatial must be 256
    # so that class_conv (4x4, stride 1, no pad) produces a 1x1 output.
    input_nc, ndf, batch, img = 3, 8, 2, 256

    params = init_params(k_param, input_nc, ndf)
    prepared = prepare_params(params)
    x = jax.random.normal(k_x, (batch, input_nc, img, img), jnp.float32)

    # Coverage check: the streamed-weight (grouped reduction) kernel path used
    # by the deep layers at full ndf=64 vs the resident-weight single-dot path.
    xt = jax.random.normal(jax.random.PRNGKey(1), (2, 8, 8, 16), jnp.float32)
    wt = 0.05 * jax.random.normal(jax.random.PRNGKey(2), (32, 16, 4, 4),
                                  jnp.float32)
    sct = jnp.ones((1, 32), jnp.float32)
    sht = jnp.zeros((1, 32), jnp.float32)
    ref_small = None
    for g in (1, 4, 16):
        og = jax.block_until_ready(
            conv4x4_s2_bn_lrelu(xt, _pack_weight(wt, g), sct, sht))
        if ref_small is None:
            ref_small = og.astype(jnp.float32)
        else:
            assert jnp.allclose(ref_small, og.astype(jnp.float32),
                                atol=3e-2, rtol=3e-2), g

    fwd = jax.jit(discriminator_256_dp)
    out = jax.block_until_ready(fwd(prepared, x))
    assert out.shape == (batch, 1), out.shape
    assert bool(jnp.all(jnp.isfinite(out)))

    ref = jax.block_until_ready(jax.jit(discriminator_256_dp_ref)(params, x))
    denom = float(jnp.max(jnp.abs(ref))) + 1e-6
    err = float(jnp.max(jnp.abs(out - ref))) / denom
    assert err < 2e-2, (out, ref, err)

    print("KERNEL_OK")
</pallas_src>

<mosaic_0001>
module attributes {stable_mosaic.version = 11 : i64} {
  func.func @_matmul_bn_lrelu_kernel(%arg0: i32, %arg1: memref<1x32x256xbf16, #tpu.memory_space<vmem>>, %arg2: memref<1x256x32xbf16, #tpu.memory_space<vmem>>, %arg3: memref<1x32xf32, #tpu.memory_space<vmem>>, %arg4: memref<1x32xf32, #tpu.memory_space<vmem>>, %arg5: memref<32x32xbf16, #tpu.memory_space<vmem>>) attributes {dimension_semantics = [#tpu.dimension_semantics<parallel>], iteration_bounds = array<i64: 1>, scalar_prefetch = 0 : i64, scratch_operands = 0 : i64, tpu.core_type = #tpu.core_type<tc>, window_params = [{transform_indices = @transform_0, window_bounds = array<i64: 1, 32, 256>}, {pipeline_mode = #tpu.pipeline_mode<synchronous>, transform_indices = @transform_1, window_bounds = array<i64: 1, 256, 32>}, {pipeline_mode = #tpu.pipeline_mode<synchronous>, transform_indices = @transform_2, window_bounds = array<i64: 1, 32>}, {pipeline_mode = #tpu.pipeline_mode<synchronous>, transform_indices = @transform_3, window_bounds = array<i64: 1, 32>}, {transform_indices = @transform_4, window_bounds = array<i64: 32, 32>}]} {
    %c0 = arith.constant 0 : index
    %c0_0 = arith.constant 0 : index
    %c0_1 = arith.constant 0 : index
    %0 = vector.load %arg1[%c0, %c0_0, %c0_1] : memref<1x32x256xbf16, #tpu.memory_space<vmem>>, vector<1x32x256xbf16>
    %1 = vector.shape_cast %0 : vector<1x32x256xbf16> to vector<32x256xbf16>
    %c0_2 = arith.constant 0 : index
    %c0_3 = arith.constant 0 : index
    %c0_4 = arith.constant 0 : index
    %2 = vector.load %arg2[%c0_2, %c0_3, %c0_4] : memref<1x256x32xbf16, #tpu.memory_space<vmem>>, vector<1x256x32xbf16>
    %3 = vector.shape_cast %2 : vector<1x256x32xbf16> to vector<256x32xbf16>
    %cst = arith.constant dense<0.000000e+00> : vector<32x32xf32>
    %4 = tpu.matmul %1, %3, %cst {dimension_numbers = #tpu.dot_dimension_numbers<[1], [0], [0], [1], [0, 0, 1, 1], [], []>} : vector<32x256xbf16>, vector<256x32xbf16>, vector<32x32xf32> -> vector<32x32xf32>
    %c0_5 = arith.constant 0 : index
    %c0_6 = arith.constant 0 : index
    %5 = vector.load %arg3[%c0_5, %c0_6] : memref<1x32xf32, #tpu.memory_space<vmem>>, vector<1x32xf32>
    %6 = vector.broadcast %5 : vector<1x32xf32> to vector<32x32xf32>
    %7 = arith.mulf %4, %6 : vector<32x32xf32>
    %c0_7 = arith.constant 0 : index
    %c0_8 = arith.constant 0 : index
    %8 = vector.load %arg4[%c0_7, %c0_8] : memref<1x32xf32, #tpu.memory_space<vmem>>, vector<1x32xf32>
    %9 = vector.broadcast %8 : vector<1x32xf32> to vector<32x32xf32>
    %10 = arith.addf %7, %9 : vector<32x32xf32>
    %cst_9 = arith.constant 0.000000e+00 : f32
    %11 = vector.broadcast %cst_9 : f32 to vector<32x32xf32>
    %12 = arith.cmpf oge, %10, %11 : vector<32x32xf32>
    %cst_10 = arith.constant 2.000000e-01 : f32
    %13 = vector.broadcast %cst_10 : f32 to vector<32x32xf32>
    %14 = arith.mulf %13, %10 : vector<32x32xf32>
    %15 = arith.select %12, %10, %14 : vector<32x32xi1>, vector<32x32xf32>
    %16 = arith.truncf %15 : vector<32x32xf32> to vector<32x32xbf16>
    %c0_11 = arith.constant 0 : index
    %c0_12 = arith.constant 0 : index
    %17 = vector.load %arg5[%c0_11, %c0_12] : memref<32x32xbf16, #tpu.memory_space<vmem>>, vector<32x32xbf16>
    tpu.vector_store %arg5[%c0_11, %c0_12], %16 {strides = array<i32>} : memref<32x32xbf16, #tpu.memory_space<vmem>>, vector<32x32xbf16>,
    return
  }
  func.func @transform_0(%arg0: i32) -> (i32, i32, i32) {
    %c0_i32 = arith.constant 0 : i32
    %c0_i32_0 = arith.constant 0 : i32
    %c0_i32_1 = arith.constant 0 : i32
    return %c0_i32, %arg0, %c0_i32_0 : i32, i32, i32
  }
  func.func @transform_1(%arg0: i32) -> (i32, i32, i32) {
    %c0_i32 = arith.constant 0 : i32
    %c0_i32_0 = arith.constant 0 : i32
    %c0_i32_1 = arith.constant 0 : i32
    %c0_i32_2 = arith.constant 0 : i32
    return %c0_i32, %c0_i32_0, %c0_i32_1 : i32, i32, i32
  }
  func.func @transform_2(%arg0: i32) -> (i32, i32) {
    %c0_i32 = arith.constant 0 : i32
    %c0_i32_0 = arith.constant 0 : i32
    %c0_i32_1 = arith.constant 0 : i32
    return %c0_i32, %c0_i32_0 : i32, i32
  }
  func.func @transform_3(%arg0: i32) -> (i32, i32) {
    %c0_i32 = arith.constant 0 : i32
    %c0_i32_0 = arith.constant 0 : i32
    %c0_i32_1 = arith.constant 0 : i32
    return %c0_i32, %c0_i32_0 : i32, i32
  }
  func.func @transform_4(%arg0: i32) -> (i32, i32) {
    %c0_i32 = arith.constant 0 : i32
    %c0_i32_0 = arith.constant 0 : i32
    return %arg0, %c0_i32 : i32, i32
  }
}

</mosaic_0001>

<bundles_post_ra>
// kernel: tpu_custom_call.1
= control target key start
LH: loop header
LB: loop body
LE: loop exit
PB: predicated region body
PF: predicated region fallthrough
CT: control target
= control target key end

     0   :  { %s524_s0 = inlined_call_operand.vmem [shape: bf16[1,32,256], index: 0, kind: input, shape index: {}]   ;;  %s525_s1 = inlined_call_operand.vmem [shape: bf16[1,256,32], index: 1, kind: input, shape index: {}]   ;;  %s526_s2 = inlined_call_operand.vmem [shape: f32[1,32], index: 2, kind: input, shape index: {}]   ;;  %s527_s3 = inlined_call_operand.vmem [shape: f32[1,32], index: 3, kind: input, shape index: {}]   ;;  %s528_s4 = inlined_call_operand.hbm [shape: bf16[32,32], index: 4, kind: output, shape index: {}]  }
   0x1   :  { %v368_v0 = vld [vmem:[%s525_s1 + $0x40] sm:$0xff]   ;;  %v370_v2 = vld [vmem:[%s525_s1 + $0x48] sm:$0xff]   ;;  %v372_v4 = vld [vmem:[%s525_s1 + $0x50] sm:$0xff]  }
   0x2   :  { %v369_v1 = vld [vmem:[%s525_s1] sm:$0xff]   ;;  %321 = vmatprep.subr.bf16.mxu0 %v368_v0  ;;  %349 = vmatprep.subr.bf16.mxu1 %v368_v0  ;;  %v371_v3 = vld [vmem:[%s525_s1 + $0x8] sm:$0xff]   ;;  %v373_v5 = vld [vmem:[%s525_s1 + $0x10] sm:$0xff]  }
   0x3   :  { %322 = vmatpush3.bf16.msra.mxu0 %v369_v1  ;;  %357 = vmatpush3.bf16.msra.mxu1 %v369_v1  ;;  %v374_v6 = vld [vmem:[%s525_s1 + $0x58] sm:$0xff]   ;;  %v376_v8 = vld [vmem:[%s525_s1 + $0x60] sm:$0xff]   ;;  %v378_v10 = vld [vmem:[%s525_s1 + $0x68] sm:$0xff]  }
   0x4   :  { %323 = vmatprep.subr.bf16.mxu0 %v370_v2  ;;  %350 = vmatprep.subr.bf16.mxu1 %v370_v2  ;;  %v375_v7 = vld [vmem:[%s525_s1 + $0x18] sm:$0xff]   ;;  %v377_v9 = vld [vmem:[%s525_s1 + $0x20] sm:$0xff]  }
   0x5   :  { %v386_v11 = vld [vmem:[%s524_s0 + $0x4] ss:$8 sps:$4 sm:$0xff]   ;;  %v389_v12 = vld [vmem:[%s524_s0 + $0x14] ss:$8 sps:$4 sm:$0xff]  }
   0x7   :  { %324 = vmatpush3.bf16.msra.mxu0 %v371_v3  ;;  %358 = vmatpush3.bf16.msra.mxu1 %v371_v3 }
   0x8   :  { %325 = vmatprep.subr.bf16.mxu0 %v372_v4  ;;  %351 = vmatprep.subr.bf16.mxu1 %v372_v4 }
   0xb   :  { %326 = vmatpush3.bf16.msra.mxu0 %v373_v5  ;;  %359 = vmatpush3.bf16.msra.mxu1 %v373_v5 }
   0xc   :  { %327 = vmatprep.subr.bf16.mxu0 %v374_v6  ;;  %352 = vmatprep.subr.bf16.mxu1 %v374_v6 }
   0xf   :  { %328 = vmatpush3.bf16.msra.mxu0 %v375_v7  ;;  %360 = vmatpush3.bf16.msra.mxu1 %v375_v7 }
  0x10   :  { %329 = vmatprep.subr.bf16.mxu0 %v376_v8  ;;  %353 = vmatprep.subr.bf16.mxu1 %v376_v8 }
  0x11   :  { %9 = vsyncpa [#allocation3], 0  ;;  %v379_v13 = vld [vmem:[%s525_s1 + $0x28] sm:$0xff]   ;;  %v380_v14 = vld [vmem:[%s525_s1 + $0x70] sm:$0xff]   ;;  %203 = vmatprep.mubr.bf16.mxu0 %v386_v11  ;;  %211 = vmatprep.mubr.bf16.mxu1 %v389_v12  ;;  %vm270_vm2 = vcmask 257024  }
  0x12   :  { %v381_v15 = vld [vmem:[%s525_s1 + $0x30] sm:$0xff]   ;;  %v382_v16 = vld [vmem:[%s525_s1 + $0x78] sm:$0xff]   ;;  %v384_v18 = vld [vmem:[%s524_s0] ss:$8 sps:$4 sm:$0xff]  }
  0x13   :  { %330 = vmatpush3.bf16.msra.mxu0 %v377_v9  ;;  %361 = vmatpush3.bf16.msra.mxu1 %v377_v9  ;;  %v383_v17 = vld [vmem:[%s525_s1 + $0x38] sm:$0xff]   ;;  %v311_v23 = vld [vmem:[%s526_s2] ss:$0 sm:$0xff] }
  0x14   :  { %331 = vmatprep.subr.bf16.mxu0 %v378_v10  ;;  %354 = vmatprep.subr.bf16.mxu1 %v378_v10  ;;  %v387_v19 = vld [vmem:[%s524_s0 + $0x10] ss:$8 sps:$4 sm:$0xff]   ;;  %v312_v29 = vld [vmem:[%s527_s3] ss:$0 sm:$0xff]  ;;  %s414_s0 = smov [#allocation2]  }
  0x15   :  { %s280_s2 = sshll.u32 %s414_s0, 4  ;;  %s281_s2 = int_to_ptr.vmem [resolvable:$true] %s280_s2 }
  0x16   :  { %s390_s3 = scalar_lea.vmem %s281_s2, 256  ;;  %p395_p1 = scmp.lt.s32.totalorder %s281_s2, %s281_s2 }
  0x17   :  { %332 = vmatpush3.bf16.msra.mxu0 %v379_v13  ;;  %362 = vmatpush3.bf16.msra.mxu1 %v379_v13  ;;  %p391_p0 = scmp.ne.s32.totalorder %s281_s2, %s390_s3  ;;  %p396_p2 = scmp.lt.s32.totalorder %s390_s3, %s390_s3 }
  0x18   :  { %333 = vmatprep.subr.bf16.mxu0 %v380_v14  ;;  %355 = vmatprep.subr.bf16.mxu1 %v380_v14 }
  0x19   :  { %p397_p3 = por %p396_p2, %p395_p1 }
  0x1b   :  { %334 = vmatpush3.bf16.msra.mxu0 %v381_v15  ;;  %363 = vmatpush3.bf16.msra.mxu1 %v381_v15  ;;  %p398_p4 = pnand %p397_p3, %p391_p0 }
  0x1c   :  { %335 = vmatprep.subr.bf16.mxu0 %v382_v16  ;;  %356 = vmatprep.subr.bf16.mxu1 %v382_v16 }
  0x1f   :  { %336 = vmatpush3.bf16.msra.mxu0 %v383_v17  ;;  %364 = vmatpush3.bf16.msra.mxu1 %v383_v17 }
  0x22   :  { %204 = vmatmul.mubr.bf16.vlgmr.msra.gmra.mrb[0].mxu0 %v384_v18  ;;  %212 = vmatmul.mubr.bf16.vlgmr.msra.gmra.mrb[0].mxu1 %v387_v19 }
  0xf5   :  { %v337_v20 = vpop.f32.mrb[0].mxu0  ;;  %v343_v21 = vpop.f32.mrb[0].mxu1 }
  0xf6   :  { %v338_v22 = vpop.f32.mrb[1].mxu0  ;;  %v344_v24 = vpop.f32.mrb[1].mxu1 }
  0xf7   :  { %v339_v25 = vadd.f32 %v338_v22, %v337_v20  ;;  %v345_v26 = vadd.f32 %v344_v24, %v343_v21  ;;  %v340_v27 = vpop.f32.mrb[2].mxu0  ;;  %v346_v28 = vpop.f32.mrb[2].mxu1 }
  0xf8   :  { %v341_v30 = vpop.f32.mrb[3].mxu0  ;;  %v347_v31 = vpop.f32.mrb[3].mxu1 }
  0xf9   :  { %v227_v32 = vmul.f32 %v339_v25, %v311_v23  ;;  %v229_v33 = vmul.f32 %v345_v26, %v311_v23  ;;  %v342_v34 = vadd.f32 %v341_v30, %v340_v27  ;;  %v348_v35 = vadd.f32 %v347_v31, %v346_v28 }
  0xfb   :  { %v238_v36 = vadd.f32 %v312_v29, %v227_v32  ;;  %v240_v37 = vadd.f32 %v312_v29, %v229_v33  ;;  %v228_v38 = vmul.f32 %v342_v34, %v311_v23  ;;  %v230_v39 = vmul.f32 %v348_v35, %v311_v23 }
  0xfd   :  { %vm242_vm0 = vcmp.ge.f32.partialorder %v238_v36, 0.0  ;;  %v246_v40 = vmul.f32 0.2, %v238_v36  ;;  %vm244_vm1 = vcmp.ge.f32.partialorder %v240_v37, 0.0  ;;  %v248_v41 = vmul.f32 0.2, %v240_v37 }
  0xfe   :  { %v239_v42 = vadd.f32 %v312_v29, %v228_v38  ;;  %v241_v43 = vadd.f32 %v312_v29, %v230_v39 }
  0xff   :  { %v250_v44 = vsel %vm242_vm0, %v238_v36, %v246_v40  ;;  %v252_v45 = vsel %vm244_vm1, %v240_v37, %v248_v41 }
 0x100   :  { %v317_v46 = vpack.c.bf16 %v250_v44, %v250_v44  ;;  %v319_v47 = vpack.c.bf16 %v252_v45, %v252_v45  ;;  %vm243_vm3 = vcmp.ge.f32.partialorder %v239_v42, 0.0  ;;  %v247_v48 = vmul.f32 0.2, %v239_v42 }
 0x101   :  { %vm245_vm4 = vcmp.ge.f32.partialorder %v241_v43, 0.0  ;;  %v249_v49 = vmul.f32 0.2, %v241_v43 }
 0x102   :  { %271 = vst.msk [vmem:[#allocation2] sm:$0xf] %vm270_vm2, %v317_v46  ;;  %273 = vst.msk [vmem:[#allocation2 + $0x8] sm:$0xf] %vm270_vm2, %v319_v47  ;;  %v251_v50 = vsel %vm243_vm3, %v239_v42, %v247_v48 }
 0x103   :  { %v318_v51 = vpack.c.bf16 %v251_v50, %v251_v50  ;;  %v253_v52 = vsel %vm245_vm4, %v241_v43, %v249_v49 }
 0x104   :  { %v320_v53 = vpack.c.bf16 %v253_v52, %v253_v52 }
 0x105   :  { %272 = vst.msk [vmem:[#allocation2 + $0x4] sm:$0xf] %vm270_vm2, %v318_v51 }
 0x106   :  { %274 = vst.msk [vmem:[#allocation2 + $0xc] sm:$0xf] %vm270_vm2, %v320_v53 }
 0x107   :  { %401 = shalt.err (!%p398_p4)
}
 0x108   :  { %s402_s8 = scalar_lea.hbm %s528_s4, 256 }
 0x109   :  { %p403_p5 = scmp.ne.s32.totalorder %s528_s4, %s402_s8  ;;  %p406_p6 = scmp.lt.u32.totalorder %s402_s8, %s528_s4 }
 0x10b   :  { %p408_p7 = pnand %p406_p6, %p403_p5 }
 0x10d   :  { %411 = shalt.err (!%p408_p7)
}
 0x10e   :  { %s415_s13 = smov 64   ;;  %s416_s14 = smov 4  }
 0x10f   :  { %286 = dma.vmem_to_hbm [thread:$0]  %s281_s2, 256, %s528_s4, [#allocation3], %s415_s13, %s415_s13, %s416_s14  }
 0x110   :  { %412 = dma.done.wait [#allocation3], 256  }
 0x111   :  { %413 = vsyncadd [#allocation3], 4294967040 }
 0x112   :  { %290 = vsyncpa [#allocation3], 1 }

</bundles_post_ra>
